<compile_context>
chip_gen: v5e
topology: v5e:2x2
jax: 0.10.0
libtpu: 0.0.40
codegen_flags: <defaults>
</compile_context>

<pallas_src>
import jax
import jax.numpy as jnp
from jax.experimental import pallas as pl
from jax.experimental.pallas import tpu as pltpu

MIN_SIGMA = 0.01
INV_SQRT_2PI = 0.3989422804014327  # 1 / sqrt(2*pi)


def _round_up(x, m):
    return ((x + m - 1) // m) * m


def _softplus(x):
    # numerically-stable softplus, matches torch.nn.Softplus semantics
    return jnp.maximum(x, 0.0) + jnp.log1p(jnp.exp(-jnp.abs(x)))


def bandit_kernel(params_ref, x_ref, eps_ref, out_ref):
    """VPU/EUP-only, lane-dense kernel.

    params_ref : SMEM (12,) f32  [W00 W01 W10 W11 b0 b1 wm0 wm1 bm ws0 ws1 bs]
    x_ref      : VMEM (2, BN)    row 0 = feature 0, row 1 = feature 1
    eps_ref    : VMEM (1, BN)    standard-normal noise (rsample reparam)
    out_ref    : VMEM (2, BN)    row 0 = clipped sample, row 1 = propensity
    """
    x0 = x_ref[0:1, :]
    x1 = x_ref[1:2, :]
    eps = eps_ref[0:1, :]

    # Scalar parameter reads from SMEM (broadcast into the FMAs below).
    w00 = params_ref[0]
    w01 = params_ref[1]
    w10 = params_ref[2]
    w11 = params_ref[3]
    b0 = params_ref[4]
    b1 = params_ref[5]
    wm0 = params_ref[6]
    wm1 = params_ref[7]
    bm = params_ref[8]
    ws0 = params_ref[9]
    ws1 = params_ref[10]
    bs = params_ref[11]

    # shared_linear: Linear(2, 2) as unrolled VPU FMAs, then Softplus.
    h0 = _softplus(x0 * w00 + x1 * w01 + b0)
    h1 = _softplus(x0 * w10 + x1 * w11 + b1)

    # mu head:    Softplus(Linear(2, 1)(softplus(h)))
    mu = _softplus(h0 * wm0 + h1 * wm1 + bm)
    # sigma head: Softplus(Linear(2, 1)(softplus(h))) + min_sigma
    sigma = _softplus(h0 * ws0 + h1 * ws1 + bs) + MIN_SIGMA

    # Normal(mu, sigma).rsample() with externally supplied standard-normal eps.
    sampled = mu + sigma * eps

    # propensity = exp(log_prob(sampled)) = exp(-eps^2/2) / (sigma * sqrt(2*pi))
    prop = jnp.exp(-0.5 * eps * eps) * (INV_SQRT_2PI / sigma)

    # Clip AFTER the propensity (matches the PyTorch forward ordering).
    out_ref[0:1, :] = jnp.clip(sampled, 0.0, 1.0)
    out_ref[1:2, :] = prop


def bandit_forward(x, w_shared, b_shared, w_mu, b_mu, w_sigma, b_sigma, eps,
                   *, block_n=None):
    """x: (N, 2) f32, eps: (N, 1) f32. Returns (sampled (N,1), propensity (N,1))."""
    n = x.shape[0]
    if block_n is None:
        # Lane-dense block; 32768 lanes * 5 f32 streams * 2 buffers ~= 1.3 MiB,
        # comfortably under v7x's 64 MiB VMEM.
        block_n = min(32768, _round_up(n, 128))
    block_n = _round_up(block_n, 128)
    n_pad = _round_up(n, block_n)
    pad = n_pad - n

    # Flat parameter vector for SMEM (order must match the kernel reads).
    params = jnp.concatenate([
        jnp.asarray(w_shared, jnp.float32).reshape(-1),   # W00 W01 W10 W11
        jnp.asarray(b_shared, jnp.float32).reshape(-1),   # b0 b1
        jnp.asarray(w_mu, jnp.float32).reshape(-1),       # wm0 wm1
        jnp.asarray(b_mu, jnp.float32).reshape(-1),       # bm
        jnp.asarray(w_sigma, jnp.float32).reshape(-1),    # ws0 ws1
        jnp.asarray(b_sigma, jnp.float32).reshape(-1),    # bs
    ])                                                     # (12,)

    # Lane-dense layout: feature on sublanes, N on lanes.
    x_t = jnp.pad(jnp.asarray(x, jnp.float32), ((0, pad), (0, 0))).T        # (2, n_pad)
    eps_t = jnp.pad(jnp.asarray(eps, jnp.float32).reshape(n, 1),
                    ((0, pad), (0, 0))).T                                   # (1, n_pad)

    grid = (n_pad // block_n,)
    out = pl.pallas_call(
        bandit_kernel,
        out_shape=jax.ShapeDtypeStruct((2, n_pad), jnp.float32),
        grid_spec=pltpu.PrefetchScalarGridSpec(
            num_scalar_prefetch=0,
            grid=grid,
            in_specs=[
                pl.BlockSpec(memory_space=pltpu.MemorySpace.SMEM),   # params (scalar)
                pl.BlockSpec((2, block_n), lambda i: (0, i)),        # x
                pl.BlockSpec((1, block_n), lambda i: (0, i)),        # eps
            ],
            out_specs=pl.BlockSpec((2, block_n), lambda i: (0, i)),  # packed outputs
        ),
        compiler_params=pltpu.CompilerParams(
            dimension_semantics=("parallel",)),
    )(params, x_t, eps_t)

    sampled = out[0, :n].reshape(n, 1)
    propensity = out[1, :n].reshape(n, 1)
    return sampled, propensity


if __name__ == "__main__":
    key = jax.random.PRNGKey(0)
    k_x, k_ws, k_bs, k_wm, k_bm, k_wsg, k_bsg, k_eps = jax.random.split(key, 8)

    N = 8
    x = jax.random.uniform(k_x, (N, 2), dtype=jnp.float32)

    # torch.nn.Linear-style uniform(-1/sqrt(fan_in), +) init
    bound2 = 1.0 / jnp.sqrt(2.0)
    w_shared = jax.random.uniform(k_ws, (2, 2), jnp.float32, -bound2, bound2)
    b_shared = jax.random.uniform(k_bs, (2,), jnp.float32, -bound2, bound2)
    w_mu = jax.random.uniform(k_wm, (1, 2), jnp.float32, -bound2, bound2)
    b_mu = jax.random.uniform(k_bm, (1,), jnp.float32, -bound2, bound2)
    w_sigma = jax.random.uniform(k_wsg, (1, 2), jnp.float32, -bound2, bound2)
    b_sigma = jax.random.uniform(k_bsg, (1,), jnp.float32, -bound2, bound2)

    # Standard-normal noise for the reparameterized sample (rsample).
    # TODO(synk): torch's internal RNG for dist.rsample() has no Pallas
    # equivalent; noise is supplied externally for deterministic parity.
    eps = jax.random.normal(k_eps, (N, 1), dtype=jnp.float32)

    sampled, propensity = bandit_forward(
        x, w_shared, b_shared, w_mu, b_mu, w_sigma, b_sigma, eps)
    jax.block_until_ready((sampled, propensity))

    # Pure-JAX reference (matches the PyTorch forward).
    def ref_forward(xr, epsr):
        h = _softplus(xr @ w_shared.T + b_shared)
        mu_r = _softplus(h @ w_mu.T + b_mu)
        sg_r = _softplus(h @ w_sigma.T + b_sigma) + MIN_SIGMA
        samp_r = mu_r + sg_r * epsr
        prop_r = jnp.exp(-0.5 * epsr * epsr) / (sg_r * jnp.sqrt(2.0 * jnp.pi))
        return jnp.clip(samp_r, 0.0, 1.0), prop_r

    samp_ref, prop_ref = ref_forward(x, eps)
    assert jnp.allclose(sampled, samp_ref, atol=1e-5), "sampled mismatch"
    assert jnp.allclose(propensity, prop_ref, atol=1e-5), "propensity mismatch"

    # Exercise a multi-block pipelined grid (3 blocks of 128 lanes).
    N2 = 300
    k2x, k2e = jax.random.split(jax.random.PRNGKey(1), 2)
    x2 = jax.random.uniform(k2x, (N2, 2), dtype=jnp.float32)
    eps2 = jax.random.normal(k2e, (N2, 1), dtype=jnp.float32)
    s2, p2 = bandit_forward(x2, w_shared, b_shared, w_mu, b_mu, w_sigma, b_sigma,
                            eps2, block_n=128)
    jax.block_until_ready((s2, p2))
    s2_ref, p2_ref = ref_forward(x2, eps2)
    assert jnp.allclose(s2, s2_ref, atol=1e-5), "sampled mismatch (grid)"
    assert jnp.allclose(p2, p2_ref, atol=1e-5), "propensity mismatch (grid)"

    print("KERNEL_OK")
</pallas_src>

<mosaic_0001>
module attributes {stable_mosaic.version = 11 : i64} {
  func.func @bandit_kernel(%arg0: i32, %arg1: memref<12xf32, #tpu.memory_space<smem>>, %arg2: memref<2x128xf32, #tpu.memory_space<vmem>>, %arg3: memref<1x128xf32, #tpu.memory_space<vmem>>, %arg4: memref<2x128xf32, #tpu.memory_space<vmem>>) attributes {dimension_semantics = [#tpu.dimension_semantics<parallel>], iteration_bounds = array<i64: 1>, scalar_prefetch = 0 : i64, scratch_operands = 0 : i64, tpu.core_type = #tpu.core_type<tc>, window_params = [{transform_indices = @transform_0, window_bounds = array<i64: 12>}, {transform_indices = @transform_1, window_bounds = array<i64: 2, 128>}, {transform_indices = @transform_2, window_bounds = array<i64: 1, 128>}, {transform_indices = @transform_3, window_bounds = array<i64: 2, 128>}]} {
    %c0 = arith.constant 0 : index
    %c0_0 = arith.constant 0 : index
    %0 = vector.load %arg2[%c0, %c0_0] : memref<2x128xf32, #tpu.memory_space<vmem>>, vector<1x128xf32>
    %c1 = arith.constant 1 : index
    %c0_1 = arith.constant 0 : index
    %1 = vector.load %arg2[%c1, %c0_1] : memref<2x128xf32, #tpu.memory_space<vmem>>, vector<1x128xf32>
    %c0_2 = arith.constant 0 : index
    %c0_3 = arith.constant 0 : index
    %2 = vector.load %arg3[%c0_2, %c0_3] : memref<1x128xf32, #tpu.memory_space<vmem>>, vector<1x128xf32>
    %c0_4 = arith.constant 0 : index
    %3 = memref.load %arg1[%c0_4] : memref<12xf32, #tpu.memory_space<smem>>
    %c1_5 = arith.constant 1 : index
    %4 = memref.load %arg1[%c1_5] : memref<12xf32, #tpu.memory_space<smem>>
    %c2 = arith.constant 2 : index
    %5 = memref.load %arg1[%c2] : memref<12xf32, #tpu.memory_space<smem>>
    %c3 = arith.constant 3 : index
    %6 = memref.load %arg1[%c3] : memref<12xf32, #tpu.memory_space<smem>>
    %c4 = arith.constant 4 : index
    %7 = memref.load %arg1[%c4] : memref<12xf32, #tpu.memory_space<smem>>
    %c5 = arith.constant 5 : index
    %8 = memref.load %arg1[%c5] : memref<12xf32, #tpu.memory_space<smem>>
    %c6 = arith.constant 6 : index
    %9 = memref.load %arg1[%c6] : memref<12xf32, #tpu.memory_space<smem>>
    %c7 = arith.constant 7 : index
    %10 = memref.load %arg1[%c7] : memref<12xf32, #tpu.memory_space<smem>>
    %c8 = arith.constant 8 : index
    %11 = memref.load %arg1[%c8] : memref<12xf32, #tpu.memory_space<smem>>
    %c9 = arith.constant 9 : index
    %12 = memref.load %arg1[%c9] : memref<12xf32, #tpu.memory_space<smem>>
    %c10 = arith.constant 10 : index
    %13 = memref.load %arg1[%c10] : memref<12xf32, #tpu.memory_space<smem>>
    %c11 = arith.constant 11 : index
    %14 = memref.load %arg1[%c11] : memref<12xf32, #tpu.memory_space<smem>>
    %15 = vector.broadcast %3 : f32 to vector<1x128xf32>
    %16 = arith.mulf %0, %15 : vector<1x128xf32>
    %17 = vector.broadcast %4 : f32 to vector<1x128xf32>
    %18 = arith.mulf %1, %17 : vector<1x128xf32>
    %19 = arith.addf %16, %18 : vector<1x128xf32>
    %20 = vector.broadcast %7 : f32 to vector<1x128xf32>
    %21 = arith.addf %19, %20 : vector<1x128xf32>
    %cst = arith.constant 0.000000e+00 : f32
    %22 = vector.broadcast %cst : f32 to vector<1x128xf32>
    %23 = arith.maximumf %21, %22 : vector<1x128xf32>
    %24 = math.absf %21 : vector<1x128xf32>
    %cst_6 = arith.constant 0.000000e+00 : f32
    %25 = vector.broadcast %cst_6 : f32 to vector<1x128xf32>
    %26 = arith.subf %25, %24 : vector<1x128xf32>
    %27 = math.exp %26 : vector<1x128xf32>
    %28 = math.log1p %27 : vector<1x128xf32>
    %29 = arith.addf %23, %28 : vector<1x128xf32>
    %30 = vector.broadcast %5 : f32 to vector<1x128xf32>
    %31 = arith.mulf %0, %30 : vector<1x128xf32>
    %32 = vector.broadcast %6 : f32 to vector<1x128xf32>
    %33 = arith.mulf %1, %32 : vector<1x128xf32>
    %34 = arith.addf %31, %33 : vector<1x128xf32>
    %35 = vector.broadcast %8 : f32 to vector<1x128xf32>
    %36 = arith.addf %34, %35 : vector<1x128xf32>
    %cst_7 = arith.constant 0.000000e+00 : f32
    %37 = vector.broadcast %cst_7 : f32 to vector<1x128xf32>
    %38 = arith.maximumf %36, %37 : vector<1x128xf32>
    %39 = math.absf %36 : vector<1x128xf32>
    %cst_8 = arith.constant 0.000000e+00 : f32
    %40 = vector.broadcast %cst_8 : f32 to vector<1x128xf32>
    %41 = arith.subf %40, %39 : vector<1x128xf32>
    %42 = math.exp %41 : vector<1x128xf32>
    %43 = math.log1p %42 : vector<1x128xf32>
    %44 = arith.addf %38, %43 : vector<1x128xf32>
    %45 = vector.broadcast %9 : f32 to vector<1x128xf32>
    %46 = arith.mulf %29, %45 : vector<1x128xf32>
    %47 = vector.broadcast %10 : f32 to vector<1x128xf32>
    %48 = arith.mulf %44, %47 : vector<1x128xf32>
    %49 = arith.addf %46, %48 : vector<1x128xf32>
    %50 = vector.broadcast %11 : f32 to vector<1x128xf32>
    %51 = arith.addf %49, %50 : vector<1x128xf32>
    %cst_9 = arith.constant 0.000000e+00 : f32
    %52 = vector.broadcast %cst_9 : f32 to vector<1x128xf32>
    %53 = arith.maximumf %51, %52 : vector<1x128xf32>
    %54 = math.absf %51 : vector<1x128xf32>
    %cst_10 = arith.constant 0.000000e+00 : f32
    %55 = vector.broadcast %cst_10 : f32 to vector<1x128xf32>
    %56 = arith.subf %55, %54 : vector<1x128xf32>
    %57 = math.exp %56 : vector<1x128xf32>
    %58 = math.log1p %57 : vector<1x128xf32>
    %59 = arith.addf %53, %58 : vector<1x128xf32>
    %60 = vector.broadcast %12 : f32 to vector<1x128xf32>
    %61 = arith.mulf %29, %60 : vector<1x128xf32>
    %62 = vector.broadcast %13 : f32 to vector<1x128xf32>
    %63 = arith.mulf %44, %62 : vector<1x128xf32>
    %64 = arith.addf %61, %63 : vector<1x128xf32>
    %65 = vector.broadcast %14 : f32 to vector<1x128xf32>
    %66 = arith.addf %64, %65 : vector<1x128xf32>
    %cst_11 = arith.constant 0.000000e+00 : f32
    %67 = vector.broadcast %cst_11 : f32 to vector<1x128xf32>
    %68 = arith.maximumf %66, %67 : vector<1x128xf32>
    %69 = math.absf %66 : vector<1x128xf32>
    %cst_12 = arith.constant 0.000000e+00 : f32
    %70 = vector.broadcast %cst_12 : f32 to vector<1x128xf32>
    %71 = arith.subf %70, %69 : vector<1x128xf32>
    %72 = math.exp %71 : vector<1x128xf32>
    %73 = math.log1p %72 : vector<1x128xf32>
    %74 = arith.addf %68, %73 : vector<1x128xf32>
    %cst_13 = arith.constant 0.00999999977 : f32
    %75 = vector.broadcast %cst_13 : f32 to vector<1x128xf32>
    %76 = arith.addf %74, %75 : vector<1x128xf32>
    %77 = arith.mulf %76, %2 : vector<1x128xf32>
    %78 = arith.addf %59, %77 : vector<1x128xf32>
    %cst_14 = arith.constant -5.000000e-01 : f32
    %79 = vector.broadcast %cst_14 : f32 to vector<1x128xf32>
    %80 = arith.mulf %79, %2 : vector<1x128xf32>
    %81 = arith.mulf %80, %2 : vector<1x128xf32>
    %82 = math.exp %81 : vector<1x128xf32>
    %cst_15 = arith.constant 0.398942292 : f32
    %83 = vector.broadcast %cst_15 : f32 to vector<1x128xf32>
    %84 = arith.divf %83, %76 : vector<1x128xf32>
    %85 = arith.mulf %82, %84 : vector<1x128xf32>
    %cst_16 = arith.constant 0.000000e+00 : f32
    %cst_17 = arith.constant 1.000000e+00 : f32
    %86 = vector.broadcast %cst_16 : f32 to vector<1x128xf32>
    %87 = arith.maximumf %86, %78 : vector<1x128xf32>
    %88 = vector.broadcast %cst_17 : f32 to vector<1x128xf32>
    %89 = arith.minimumf %88, %87 : vector<1x128xf32>
    %c0_18 = arith.constant 0 : index
    %c0_19 = arith.constant 0 : index
    %90 = vector.load %arg4[%c0_18, %c0_19] : memref<2x128xf32, #tpu.memory_space<vmem>>, vector<1x128xf32>
    tpu.vector_store %arg4[%c0_18, %c0_19], %89 {strides = array<i32>} : memref<2x128xf32, #tpu.memory_space<vmem>>, vector<1x128xf32>,
    %c1_20 = arith.constant 1 : index
    %c0_21 = arith.constant 0 : index
    %91 = vector.load %arg4[%c1_20, %c0_21] : memref<2x128xf32, #tpu.memory_space<vmem>>, vector<1x128xf32>
    tpu.vector_store %arg4[%c1_20, %c0_21], %85 {strides = array<i32>} : memref<2x128xf32, #tpu.memory_space<vmem>>, vector<1x128xf32>,
    return
  }
  func.func @transform_0(%arg0: i32) -> i32 {
    %c0_i32 = arith.constant 0 : i32
    %c0_i32_0 = arith.constant 0 : i32
    return %c0_i32 : i32
  }
  func.func @transform_1(%arg0: i32) -> (i32, i32) {
    %c0_i32 = arith.constant 0 : i32
    %c0_i32_0 = arith.constant 0 : i32
    return %c0_i32, %arg0 : i32, i32
  }
  func.func @transform_2(%arg0: i32) -> (i32, i32) {
    %c0_i32 = arith.constant 0 : i32
    %c0_i32_0 = arith.constant 0 : i32
    return %c0_i32, %arg0 : i32, i32
  }
  func.func @transform_3(%arg0: i32) -> (i32, i32) {
    %c0_i32 = arith.constant 0 : i32
    %c0_i32_0 = arith.constant 0 : i32
    return %c0_i32, %arg0 : i32, i32
  }
}

</mosaic_0001>

<bundles_post_ra>
// kernel: tpu_custom_call.1
= control target key start
LH: loop header
LB: loop body
LE: loop exit
PB: predicated region body
PF: predicated region fallthrough
CT: control target
= control target key end

     0   :  { %8 = vsyncpa [#allocation5], 0  ;;  %s328_s0 = inlined_call_operand.hbm [shape: f32[12], index: 0, kind: input, shape index: {}]   ;;  %s329_s1 = inlined_call_operand.hbm [shape: f32[2,128], index: 1, kind: input, shape index: {}]   ;;  %s330_s2 = inlined_call_operand.vmem [shape: f32[1,128], index: 2, kind: input, shape index: {}]   ;;  %s331_s3 = inlined_call_operand.hbm [shape: f32[2,128], index: 3, kind: output, shape index: {}]  }
   0x1   :  { %9 = vsyncpa [#allocation3], 0 }
   0x2   :  { %10 = vsyncpa [#allocation4], 0  ;;  %s16_s14 = sshll.u32 %s328_s0, 4  ;;  %s25_s17 = sshll.u32 %s329_s1, 4  ;;  %s17_s14 = int_to_ptr.hbm [resolvable:$true] %s16_s14  ;;  %s26_s17 = int_to_ptr.hbm [resolvable:$true] %s25_s17 }
   0x3   :  { %s290_s18 = smov [#allocation2]   ;;  %s291_s19 = smov [#allocation6]  }
   0x4   :  { %19 = dma.hbm_to_smem %s17_s14, 16, %s290_s18, [#allocation5]  }
   0x5   :  { %s27_s20 = sshll.u32 %s291_s19, 4  ;;  %s28_s20 = int_to_ptr.vmem [resolvable:$true] %s27_s20 }
   0x6   :  { %30 = dma.hbm_to_vmem [thread:$0]  %s26_s17, 32, %s28_s20, [#allocation3]  }
   0x7   :  { %284 = dma.done.wait [#allocation5], 16  }
   0x8   :  { %285 = vsyncadd [#allocation5], 4294967280 }
   0x9   :  { %286 = dma.done.wait [#allocation3], 32  }
   0xa   :  { %287 = vsyncadd [#allocation3], 4294967264 }
   0xb   :  { %41 = sfence }
   0xc   :  { %s45_s21 = sld [smem:[#allocation2]]  ;;  %v42_v0 = vld [vmem:[#allocation6] sm:$0x1]  ;;  %v43_v1 = vld [vmem:[#allocation6 + $0x1] sm:$0x1]  ;;  %s179_s9 = sshll.u32 %s331_s3, 4  ;;  %s180_s9 = int_to_ptr.hbm [resolvable:$true] %s179_s9 }
   0xd   :  { %s190_s22 = sld [smem:[#allocation2 + $0x1]] }
   0xe   :  { %s191_s0 = sld [smem:[#allocation2 + $0x2]] }
   0xf   :  { %s192_s23 = sld [smem:[#allocation2 + $0x3]] }
  0x10   :  { %s193_s24 = sld [smem:[#allocation2 + $0x4]] }
  0x11   :  { %s194_s1 = sld [smem:[#allocation2 + $0x5]] }
  0x12   :  { %v57_v2 = vstv %s45_s21  ;;  %s319_s25 = sld [smem:[#allocation2 + $0x6]] }
  0x13   :  { %v58_v3 = vmul.f32 %v57_v2, %v42_v0  ;;  %v59_v4 = vstv %s190_s22  ;;  %s198_s26 = sld [smem:[#allocation2 + $0x9]] }
  0x14   :  { %v60_v5 = vmul.f32 %v59_v4, %v43_v1  ;;  %v79_v6 = vstv %s191_s0  ;;  %s196_s27 = sld [smem:[#allocation2 + $0x7]] }
  0x15   :  { %v80_v7 = vmul.f32 %v79_v6, %v42_v0  ;;  %v81_v8 = vstv %s192_s23  ;;  %s199_s28 = sld [smem:[#allocation2 + $0xa]] }
  0x16   :  { %v61_v9 = vadd.f32 %v60_v5, %v58_v3  ;;  %v62_v10 = vstv %s193_s24  ;;  %v82_v11 = vmul.f32 %v81_v8, %v43_v1  ;;  %s197_s29 = sld [smem:[#allocation2 + $0x8]] }
  0x17   :  { %v84_v12 = vstv %s194_s1  ;;  %s200_s30 = sld [smem:[#allocation2 + $0xb]] }
  0x18   :  { %v63_v13 = vadd.f32 %v62_v10, %v61_v9  ;;  %v83_v14 = vadd.f32 %v82_v11, %v80_v7  ;;  %v101_v41 = vstv %s319_s25 }
  0x19   :  { %v123_v42 = vstv %s198_s26 }
  0x1a   :  { %v65_v15 = vand.u32 2147483647, %v63_v13  ;;  %v85_v16 = vadd.f32 %v84_v12, %v83_v14  ;;  %v64_v34 = vmax.f32 %v63_v13, 0.0  ;;  %v103_v45 = vstv %s196_s27 }
  0x1b   :  { %v125_v46 = vstv %s199_s28 }
  0x1c   :  { %v66_v17 = vsub.f32 0.0, %v65_v15  ;;  %v87_v18 = vand.u32 2147483647, %v85_v16  ;;  %v86_v38 = vmax.f32 %v85_v16, 0.0  ;;  %v106_v52 = vstv %s197_s29 }
  0x1d   :  { %v128_v53 = vstv %s200_s30 }
  0x1e   :  { %v67_v19 = vmul.f32 1.442695, %v66_v17  ;;  %v88_v20 = vsub.f32 0.0, %v87_v18  ;;  %v44_v18 = vld [vmem:[%s330_s2] sm:$0x1]  ;;  %s292_s2 = smov [#allocation7]  }
  0x1f   :  { %s177_s6 = sshll.u32 %s292_s2, 4  ;;  %s178_s6 = int_to_ptr.vmem [resolvable:$true] %s177_s6 }
  0x20   :  { %204 = vpow2.f32 %v67_v19  ;;  %v89_v21 = vmul.f32 1.442695, %v88_v20 }
  0x22   :  { %206 = vpow2.f32 %v89_v21 }
  0x26   :  { %v205_v22 = vpop.eup %204 }
  0x27   :  { %v69_v23 = vadd.f32 1.0, %v205_v22  ;;  %v72_v24 = vmul.f32 -0.5, %v205_v22  ;;  %v75_v29 = vand.u32 2147483647, %v205_v22 }
  0x28   :  { %v207_v25 = vpop.eup %206 }
  0x29   :  { %208 = vlog2.f32 %v69_v23  ;;  %v91_v26 = vadd.f32 1.0, %v207_v25  ;;  %v73_v27 = vadd.f32 1.0, %v72_v24  ;;  %v94_v28 = vmul.f32 -0.5, %v207_v25 }
  0x2a   :  { %v97_v31 = vand.u32 2147483647, %v207_v25  ;;  %vm76_vm0 = vcmp.lt.f32.partialorder %v75_v29, 0.0004427343  ;;  %v148_v24 = vmul.f32 -0.5, %v44_v18 }
  0x2b   :  { %210 = vlog2.f32 %v91_v26  ;;  %v95_v30 = vadd.f32 1.0, %v94_v28  ;;  %v74_v32 = vmul.f32 %v205_v22, %v73_v27 }
  0x2c   :  { %vm98_vm1 = vcmp.lt.f32.partialorder %v97_v31, 0.0004427343  ;;  %v149_v27 = vmul.f32 %v148_v24, %v44_v18 }
  0x2d   :  { %v96_v36 = vmul.f32 %v207_v25, %v95_v30 }
  0x2e   :  { %v150_v31 = vmul.f32 1.442695, %v149_v27 }
  0x2f   :  { %v209_v33 = vpop.eup %208 }
  0x30   :  { %v71_v35 = vmul.f32 0.6931472, %v209_v33 }
  0x31   :  { %v211_v37 = vpop.eup %210 }
  0x32   :  { %v77_v39 = vsel %vm76_vm0, %v74_v32, %v71_v35  ;;  %v93_v40 = vmul.f32 0.6931472, %v211_v37 }
  0x33   :  { %v78_v43 = vadd.f32 %v77_v39, %v64_v34 }
  0x34   :  { %v99_v44 = vsel %vm98_vm1, %v96_v36, %v93_v40 }
  0x35   :  { %v100_v47 = vadd.f32 %v99_v44, %v86_v38  ;;  %v102_v48 = vmul.f32 %v101_v41, %v78_v43  ;;  %v124_v49 = vmul.f32 %v123_v42, %v78_v43 }
  0x37   :  { %v104_v50 = vmul.f32 %v103_v45, %v100_v47  ;;  %v126_v51 = vmul.f32 %v125_v46, %v100_v47 }
  0x39   :  { %v105_v54 = vadd.f32 %v104_v50, %v102_v48  ;;  %v127_v55 = vadd.f32 %v126_v51, %v124_v49 }
  0x3b   :  { %v107_v56 = vadd.f32 %v106_v52, %v105_v54  ;;  %v129_v57 = vadd.f32 %v128_v53, %v127_v55 }
  0x3d   :  { %v109_v58 = vand.u32 2147483647, %v107_v56  ;;  %v131_v59 = vand.u32 2147483647, %v129_v57  ;;  %v130_v12 = vmax.f32 %v129_v57, 0.0  ;;  %v108_v17 = vmax.f32 %v107_v56, 0.0 }
  0x3f   :  { %v110_v60 = vsub.f32 0.0, %v109_v58  ;;  %v132_v61 = vsub.f32 0.0, %v131_v59 }
  0x41   :  { %v111_v62 = vmul.f32 1.442695, %v110_v60  ;;  %v133_v63 = vmul.f32 1.442695, %v132_v61 }
  0x43   :  { %212 = vpow2.f32 %v111_v62 }
  0x44   :  { %214 = vpow2.f32 %v133_v63 }
  0x49   :  { %v213_v0 = vpop.eup %212 }
  0x4a   :  { %v215_v1 = vpop.eup %214  ;;  %v113_v2 = vadd.f32 1.0, %v213_v0  ;;  %v116_v3 = vmul.f32 -0.5, %v213_v0  ;;  %v119_v8 = vand.u32 2147483647, %v213_v0 }
  0x4b   :  { %v135_v4 = vadd.f32 1.0, %v215_v1  ;;  %v138_v5 = vmul.f32 -0.5, %v215_v1  ;;  %v141_v9 = vand.u32 2147483647, %v215_v1 }
  0x4c   :  { %216 = vlog2.f32 %v113_v2  ;;  %v117_v6 = vadd.f32 1.0, %v116_v3  ;;  %vm120_vm2 = vcmp.lt.f32.partialorder %v119_v8, 0.0004427343 }
  0x4d   :  { %218 = vlog2.f32 %v135_v4  ;;  %v139_v7 = vadd.f32 1.0, %v138_v5  ;;  %vm142_vm3 = vcmp.lt.f32.partialorder %v141_v9, 0.0004427343 }
  0x4e   :  { %v118_v11 = vmul.f32 %v213_v0, %v117_v6 }
  0x4f   :  { %v140_v13 = vmul.f32 %v215_v1, %v139_v7 }
  0x52   :  { %v217_v10 = vpop.eup %216 }
  0x53   :  { %v219_v14 = vpop.eup %218  ;;  %v115_v15 = vmul.f32 0.6931472, %v217_v10 }
  0x54   :  { %v137_v16 = vmul.f32 0.6931472, %v219_v14 }
  0x55   :  { %v121_v19 = vsel %vm120_vm2, %v118_v11, %v115_v15 }
  0x56   :  { %v143_v20 = vsel %vm142_vm3, %v140_v13, %v137_v16  ;;  %v122_v22 = vadd.f32 %v121_v19, %v108_v17 }
  0x57   :  { %v144_v21 = vadd.f32 %v143_v20, %v130_v12 }
  0x59   :  { %v145_v23 = vadd.f32 0.01, %v144_v21 }
  0x5b   :  { %v146_v25 = vmul.f32 %v145_v23, %v44_v18  ;;  %220 = vrcp.f32 %v145_v23  ;;  %v163_v33 = vand.u32 2147483648, %v145_v23  ;;  %vm157_vm4 = vweird.f32 %v145_v23 }
  0x5c   :  { %v161_v35 = vand.u32 2147483647, %v145_v23  ;;  %222 = vpow2.f32 %v150_v31 }
  0x5d   :  { %v147_v26 = vadd.f32 %v146_v25, %v122_v22  ;;  %v164_v37 = vor.u32 1.1754944e-38, %v163_v33 }
  0x5e   :  { %vm162_vm7 = vcmp.eq.f32.partialorder %v161_v35, 8.507059e+37 }
  0x5f   :  { %v168_v28 = vmax.f32 %v147_v26, 0.0 }
  0x61   :  { %v221_v29 = vpop.eup %220  ;;  %v169_v30 = vmin.f32 %v168_v28, 1.0 }
  0x62   :  { %v153_v32 = vmul.f32 %v221_v29, %v145_v23  ;;  %vm158_vm5 = vweird.f32 %v221_v29  ;;  %v223_v40 = vpop.eup %222 }
  0x63   :  { %170 = vst [vmem:[#allocation7] sm:$0x1] %v169_v30  ;;  %vm159_vm6 = vmor %vm157_vm4, %vm158_vm5 }
  0x64   :  { %v154_v34 = vsub.f32 1.0, %v153_v32 }
  0x66   :  { %v155_v36 = vmul.f32 %v221_v29, %v154_v34 }
  0x68   :  { %v156_v38 = vadd.f32 %v221_v29, %v155_v36 }
  0x6a   :  { %v160_v39 = vsel %vm159_vm6, %v221_v29, %v156_v38 }
  0x6b   :  { %v165_v41 = vsel %vm162_vm7, %v164_v37, %v160_v39 }
  0x6c   :  { %v166_v42 = vmul.f32 0.3989423, %v165_v41 }
  0x6e   :  { %v167_v43 = vmul.f32 %v223_v40, %v166_v42 }
  0x70   :  { %171 = vst [vmem:[#allocation7 + $0x1] sm:$0x1] %v167_v43 }
  0x71   :  { %182 = dma.vmem_to_hbm [thread:$0]  %s178_s6, 32, %s180_s9, [#allocation4]  }
  0x72   :  { %288 = dma.done.wait [#allocation4], 32  }
  0x73   :  { %289 = vsyncadd [#allocation4], 4294967264 }
  0x74   :  { %187 = vsyncpa [#allocation3], 1 }
  0x75   :  { %188 = vsyncpa [#allocation4], 1 }
  0x76   :  { %189 = vsyncpa [#allocation5], 1 }

</bundles_post_ra>
